<compile_context>
chip_gen: v7x
topology: tpu7x:2x2x1
jax: 0.10.0
libtpu: 0.0.40
codegen_flags: <defaults>
</compile_context>

<pallas_src>
import jax
import jax.numpy as jnp
import numpy as np
from jax.experimental import pallas as pl
from jax.experimental.pallas import tpu as pltpu


def _dma_identity_kernel(x_hbm, o_hbm, sem):
    # One whole-array HBM->HBM DMA: issue, then block until the semaphore fires.
    copy = pltpu.make_async_copy(x_hbm, o_hbm, sem)
    copy.start()
    copy.wait()


def _dma_identity(x: jax.Array) -> jax.Array:
    """Bit-exact copy of `x` into a fresh HBM buffer via a single DMA."""
    itemsize = jnp.dtype(x.dtype).itemsize
    return pl.pallas_call(
        _dma_identity_kernel,
        out_shape=jax.ShapeDtypeStruct(x.shape, x.dtype),
        # No grid, no VMEM tiles: both refs stay in HBM and the DMA engine
        # moves the data directly (bandwidth-optimal, zero VMEM pressure on
        # every generation, nothing to retune for v7x's 64 MiB VMEM).
        in_specs=[pl.BlockSpec(memory_space=pl.ANY)],
        out_specs=pl.BlockSpec(memory_space=pl.ANY),
        scratch_shapes=[pltpu.SemaphoreType.DMA(())],
        cost_estimate=pl.CostEstimate(
            flops=0,
            transcendentals=0,
            bytes_accessed=2 * x.size * itemsize,
        ),
    )(x)


_dma_identity_jit = jax.jit(_dma_identity)


def base_forward(x: jax.Array, force_kernel: bool = False) -> jax.Array:
    """Pallas equivalent of Base.forward (identity placeholder).

    Default: return `x` untouched — zero HBM traffic, zero kernel overhead.
    `force_kernel=True`: run the single HBM->HBM DMA copy kernel instead
    (produces a fresh buffer with identical contents).
    """
    if force_kernel:
        return _dma_identity_jit(x)
    return x


if __name__ == "__main__":
    key = jax.random.PRNGKey(0)
    # Small NCHW input consistent with a conv-style module: (N=2, C=4, H=16, W=16).
    x = jax.random.normal(key, (2, 4, 16, 16), dtype=jnp.float32)
    x_host = np.asarray(jax.device_get(x))

    # Default (recommended) path: pure pass-through, no kernel launch.
    y = jax.block_until_ready(base_forward(x))
    assert y.shape == x_host.shape, (y.shape, x_host.shape)
    assert y.dtype == x_host.dtype, (y.dtype, x_host.dtype)
    assert np.array_equal(np.asarray(jax.device_get(y)), x_host), "identity mismatch"

    # Kernel path (behind the flag): single HBM->HBM DMA copy, run once.
    y_kernel = jax.block_until_ready(base_forward(x, force_kernel=True))
    assert y_kernel.shape == x_host.shape, (y_kernel.shape, x_host.shape)
    assert y_kernel.dtype == x_host.dtype, (y_kernel.dtype, x_host.dtype)
    assert np.array_equal(
        np.asarray(jax.device_get(y_kernel)), x_host
    ), "DMA identity kernel mismatch"

    print("KERNEL_OK")
</pallas_src>

<mosaic_0001>
module attributes {stable_mosaic.version = 11 : i64} {
  func.func @_dma_identity_kernel(%arg0: memref<2x4x16x16xf32, #tpu.memory_space<any>>, %arg1: memref<2x4x16x16xf32, #tpu.memory_space<any>>, %arg2: memref<!tpu.dma_semaphore, #tpu.memory_space<semaphore_mem>>) attributes {dimension_semantics = [], scalar_prefetch = 0 : i64, scratch_operands = 1 : i64, tpu.core_type = #tpu.core_type<tc>} {
    tpu.enqueue_dma source(%arg0 : memref<2x4x16x16xf32, #tpu.memory_space<any>>) target(%arg1 : memref<2x4x16x16xf32, #tpu.memory_space<any>>) target_semaphore(%arg2 : memref<!tpu.dma_semaphore, #tpu.memory_space<semaphore_mem>>)
    tpu.wait_dma2 semaphore(%arg2 : memref<!tpu.dma_semaphore, #tpu.memory_space<semaphore_mem>>) src(%arg0 : memref<2x4x16x16xf32, #tpu.memory_space<any>>) dst(%arg1 : memref<2x4x16x16xf32, #tpu.memory_space<any>>)
    return
  }
}

</mosaic_0001>

<bundles_post_ra>
// kernel: _dma_identity.1
= control target key start
LH: loop header
LB: loop body
LE: loop exit
PB: predicated region body
PF: predicated region fallthrough
CT: control target
= control target key end

     0   :  { %s36_s6 = smov [#allocation2]   ;;  %s37_s7 = smov [#allocation3]   ;;  %s55_s0 = inlined_call_operand.hbm [shape: f32[2,4,16,16], index: 0, kind: input, shape index: {}]   ;;  %s56_s1 = inlined_call_operand.hbm [shape: f32[2,4,16,16], index: 1, kind: output, shape index: {}]  }
   0x1   :  { %s38_s8 = smov 0  }
   0x2   :  { %18 = dma.general %s55_s0, 2048, %s56_s1, %s36_s6, %s37_s7, [#allocation4], %s38_s8, 0  }
   0x3   :  { %34 = dma.done.wait [#allocation2], 2048 }
   0x4   :  { %35 = vsyncadd [#allocation2], 4294965248 }
   0x5   :  { %24 = vsyncmov [#allocation2] }
   0x8   :  { %s25_s13 = vpop.sfrf %24 }
   0x9   :  { %p30_p0 = scmp.ne.s32.totalorder %s25_s13, 0 }
   0xb   :  { %29 = shalt.err (%p30_p0)  }

</bundles_post_ra>
